<compile_context>
chip_gen: v5e
topology: v5e:2x2
jax: 0.10.0
libtpu: 0.0.40
codegen_flags: <defaults>
</compile_context>

<pallas_src>
import jax
import jax.numpy as jnp
from jax.experimental import pallas as pl
from jax.experimental.pallas import tpu as pltpu


def channel_attention_kernel(x_ref, w1t_ref, w2t_ref, o_ref):
    # x_ref:  (TB, C, L)  native layout, L on the lane axis
    # w1t_ref:(C, H)      fc1 weight, pre-transposed (contract over lanes)
    # w2t_ref:(H, C)      fc2 weight, pre-transposed
    # o_ref:  (TB, C)     lane-dense output
    x = x_ref[...]
    tb, _, L = x.shape

    # AdaptiveAvgPool1d(1) / AdaptiveMaxPool1d(1): reduce over L (lane axis,
    # XLU). Accumulate the sum in f32 without materializing an f32 copy of x.
    avg = jnp.sum(x, axis=-1, dtype=jnp.float32) * (1.0 / L)      # (TB, C)
    mx = jnp.max(x, axis=-1).astype(jnp.float32)                  # (TB, C)

    w1t = w1t_ref[...].astype(jnp.float32)                        # (C, H)
    w2t = w2t_ref[...].astype(jnp.float32)                        # (H, C)

    def fc(p):  # (rows, C) -> (rows, C): fc2(relu(fc1(p)))
        h = jnp.maximum(
            jnp.dot(p, w1t, preferred_element_type=jnp.float32), 0.0)
        return jnp.dot(h, w2t, preferred_element_type=jnp.float32)

    if tb % 8 == 0:
        # Single matmul pass over both pooled halves; the split point is
        # sublane-tile aligned (tb is a multiple of 8).
        y = fc(jnp.concatenate([avg, mx], axis=0))                # (2*TB, C)
        out = y[:tb] + y[tb:]                                     # (TB, C)
    else:
        # Tiny-batch path: avoid a non-(8,*)-aligned concat/split entirely;
        # the duplicated (trivially small) matmul is cheaper than the XLU
        # sublane shuffles it would force.
        out = fc(avg) + fc(mx)                                    # (TB, C)

    o_ref[...] = jax.nn.sigmoid(out).astype(o_ref.dtype)


def _pick_batch_tile(B, C, L, itemsize):
    """Largest sublane-aligned batch tile that keeps the double-buffered
    input block within a VMEM budget safe for v5e / v6e / v7x, while
    guaranteeing >= 2 grid steps whenever B allows (v7x megacore)."""
    if B <= 8:
        return B
    vmem_budget = 24 << 20                       # double-buffered input budget
    bytes_per_row = max(1, C * L * itemsize)
    tb = vmem_budget // (2 * bytes_per_row)
    tb = max(8, (tb // 8) * 8)
    # Keep at least two grid steps so dimension_semantics=("parallel",) can
    # shard the batch axis across both TensorCores on v7x.
    half = (((B + 1) // 2) + 7) // 8 * 8
    tb = min(tb, half)
    return max(8, tb)


def channel_attention(x, w1, w2):
    """x: (B, C, L); w1: (H, C) fc1 weight; w2: (C, H) fc2 weight.

    Returns (B, C, 1), matching the PyTorch module's output shape.
    """
    B, C, L = x.shape
    H = w1.shape[0]

    # Weights pre-transposed (tiny, free) so the in-kernel contractions are
    # lane-aligned. x itself is NOT transposed -> no extra HBM pass.
    w1t = w1.T                                   # (C, H)
    w2t = w2.T                                   # (H, C)

    TB = _pick_batch_tile(B, C, L, x.dtype.itemsize)
    grid = (pl.cdiv(B, TB),)

    out = pl.pallas_call(
        channel_attention_kernel,
        out_shape=jax.ShapeDtypeStruct((B, C), x.dtype),
        grid_spec=pltpu.PrefetchScalarGridSpec(
            num_scalar_prefetch=0,
            grid=grid,
            in_specs=[
                pl.BlockSpec((TB, C, L), lambda b: (b, 0, 0)),
                pl.BlockSpec((C, H), lambda b: (0, 0)),
                pl.BlockSpec((H, C), lambda b: (0, 0)),
            ],
            out_specs=pl.BlockSpec((TB, C), lambda b: (b, 0)),
        ),
        compiler_params=pltpu.CompilerParams(
            dimension_semantics=("parallel",),
            vmem_limit_bytes=40 * 1024 * 1024),
    )(x, w1t, w2t)

    # Lane-dense (B, C) kernel output -> module's (B, C, 1) NCL shape.
    return out[:, :, None]


def channel_attention_ref(x, w1, w2):
    # Pure-JAX reference mirroring the PyTorch forward.
    avg = jnp.mean(x, axis=-1, keepdims=True)                      # (B, C, 1)
    mx = jnp.max(x, axis=-1, keepdims=True)                        # (B, C, 1)

    def fc(p):  # p: (B, C, 1)
        h = jnp.maximum(jnp.einsum('hc,bcl->bhl', w1, p), 0.0)
        return jnp.einsum('ch,bhl->bcl', w2, h)

    return jax.nn.sigmoid(fc(avg) + fc(mx))


def _make_inputs(key, B, C, L, H):
    kx, k1, k2 = jax.random.split(key, 3)
    x = jax.random.normal(kx, (B, C, L), dtype=jnp.float32)
    # Conv1d(in_planes, in_planes//ratio, 1, bias=False) weight: (H, C, 1)->(H, C)
    w1 = jax.random.normal(k1, (H, C), dtype=jnp.float32) * (1.0 / jnp.sqrt(C))
    # Conv1d(in_planes//ratio, in_planes, 1, bias=False) weight: (C, H, 1)->(C, H)
    w2 = jax.random.normal(k2, (C, H), dtype=jnp.float32) * (1.0 / jnp.sqrt(H))
    return x, w1, w2


if __name__ == "__main__":
    key = jax.random.PRNGKey(0)

    # Case 1: tiny batch (exercises the non-aligned two-pass fc path).
    B, C, L = 2, 64, 16
    ratio = 16
    H = C // ratio
    k1, k2 = jax.random.split(key)
    x, w1, w2 = _make_inputs(k1, B, C, L, H)

    out = channel_attention(x, w1, w2)
    out = jax.block_until_ready(out)
    ref = channel_attention_ref(x, w1, w2)
    assert out.shape == (B, C, 1)
    assert jnp.allclose(out, ref, atol=1e-5, rtol=1e-5)

    # Case 2: batch >= 16 (exercises the sublane-aligned single-matmul path
    # and a >= 2-step parallel grid, as used for v7x megacore sharding).
    B2, C2, L2 = 16, 64, 32
    H2 = C2 // ratio
    x2, w12, w22 = _make_inputs(k2, B2, C2, L2, H2)

    out2 = channel_attention(x2, w12, w22)
    out2 = jax.block_until_ready(out2)
    ref2 = channel_attention_ref(x2, w12, w22)
    assert out2.shape == (B2, C2, 1)
    assert jnp.allclose(out2, ref2, atol=1e-5, rtol=1e-5)

    print("KERNEL_OK")
</pallas_src>

<mosaic_0001>
module attributes {stable_mosaic.version = 11 : i64} {
  func.func @channel_attention_kernel(%arg0: i32, %arg1: memref<2x64x16xf32, #tpu.memory_space<vmem>>, %arg2: memref<64x4xf32, #tpu.memory_space<vmem>>, %arg3: memref<4x64xf32, #tpu.memory_space<vmem>>, %arg4: memref<2x64xf32, #tpu.memory_space<vmem>>) attributes {dimension_semantics = [#tpu.dimension_semantics<parallel>], iteration_bounds = array<i64: 1>, scalar_prefetch = 0 : i64, scratch_operands = 0 : i64, tpu.core_type = #tpu.core_type<tc>, window_params = [{transform_indices = @transform_0, window_bounds = array<i64: 2, 64, 16>}, {pipeline_mode = #tpu.pipeline_mode<synchronous>, transform_indices = @transform_1, window_bounds = array<i64: 64, 4>}, {pipeline_mode = #tpu.pipeline_mode<synchronous>, transform_indices = @transform_2, window_bounds = array<i64: 4, 64>}, {transform_indices = @transform_3, window_bounds = array<i64: 2, 64>}]} {
    %c0 = arith.constant 0 : index
    %c0_0 = arith.constant 0 : index
    %c0_1 = arith.constant 0 : index
    %0 = vector.load %arg1[%c0, %c0_0, %c0_1] : memref<2x64x16xf32, #tpu.memory_space<vmem>>, vector<2x64x16xf32>
    %cst = arith.constant dense<0.000000e+00> : vector<2x64xf32>
    %1 = vector.multi_reduction <add>, %0, %cst [2] : vector<2x64x16xf32> to vector<2x64xf32>
    %cst_2 = arith.constant 6.250000e-02 : f32
    %2 = vector.broadcast %cst_2 : f32 to vector<2x64xf32>
    %3 = arith.mulf %1, %2 : vector<2x64xf32>
    %cst_3 = arith.constant dense<0xFF800000> : vector<2x64xf32>
    %4 = vector.multi_reduction <maximumf>, %0, %cst_3 [2] : vector<2x64x16xf32> to vector<2x64xf32>
    %c0_4 = arith.constant 0 : index
    %c0_5 = arith.constant 0 : index
    %5 = vector.load %arg2[%c0_4, %c0_5] : memref<64x4xf32, #tpu.memory_space<vmem>>, vector<64x4xf32>
    %c0_6 = arith.constant 0 : index
    %c0_7 = arith.constant 0 : index
    %6 = vector.load %arg3[%c0_6, %c0_7] : memref<4x64xf32, #tpu.memory_space<vmem>>, vector<4x64xf32>
    %cst_8 = arith.constant dense<0.000000e+00> : vector<2x4xf32>
    %7 = tpu.matmul %3, %5, %cst_8 {dimension_numbers = #tpu.dot_dimension_numbers<[1], [0], [0], [1], [0, 0, 1, 1], [], []>} : vector<2x64xf32>, vector<64x4xf32>, vector<2x4xf32> -> vector<2x4xf32>
    %cst_9 = arith.constant 0.000000e+00 : f32
    %8 = vector.broadcast %cst_9 : f32 to vector<2x4xf32>
    %9 = arith.maximumf %7, %8 : vector<2x4xf32>
    %cst_10 = arith.constant dense<0.000000e+00> : vector<2x64xf32>
    %10 = tpu.matmul %9, %6, %cst_10 {dimension_numbers = #tpu.dot_dimension_numbers<[1], [0], [0], [1], [0, 0, 1, 1], [], []>} : vector<2x4xf32>, vector<4x64xf32>, vector<2x64xf32> -> vector<2x64xf32>
    %cst_11 = arith.constant dense<0.000000e+00> : vector<2x4xf32>
    %11 = tpu.matmul %4, %5, %cst_11 {dimension_numbers = #tpu.dot_dimension_numbers<[1], [0], [0], [1], [0, 0, 1, 1], [], []>} : vector<2x64xf32>, vector<64x4xf32>, vector<2x4xf32> -> vector<2x4xf32>
    %cst_12 = arith.constant 0.000000e+00 : f32
    %12 = vector.broadcast %cst_12 : f32 to vector<2x4xf32>
    %13 = arith.maximumf %11, %12 : vector<2x4xf32>
    %cst_13 = arith.constant dense<0.000000e+00> : vector<2x64xf32>
    %14 = tpu.matmul %13, %6, %cst_13 {dimension_numbers = #tpu.dot_dimension_numbers<[1], [0], [0], [1], [0, 0, 1, 1], [], []>} : vector<2x4xf32>, vector<4x64xf32>, vector<2x64xf32> -> vector<2x64xf32>
    %15 = arith.addf %10, %14 : vector<2x64xf32>
    %16 = arith.negf %15 : vector<2x64xf32>
    %17 = math.exp %16 : vector<2x64xf32>
    %cst_14 = arith.constant 1.000000e+00 : f32
    %18 = vector.broadcast %cst_14 : f32 to vector<2x64xf32>
    %19 = arith.addf %18, %17 : vector<2x64xf32>
    %20 = arith.divf %18, %19 : vector<2x64xf32>
    %c0_15 = arith.constant 0 : index
    %c0_16 = arith.constant 0 : index
    %21 = vector.load %arg4[%c0_15, %c0_16] : memref<2x64xf32, #tpu.memory_space<vmem>>, vector<2x64xf32>
    tpu.vector_store %arg4[%c0_15, %c0_16], %20 {strides = array<i32>} : memref<2x64xf32, #tpu.memory_space<vmem>>, vector<2x64xf32>,
    return
  }
  func.func @transform_0(%arg0: i32) -> (i32, i32, i32) {
    %c0_i32 = arith.constant 0 : i32
    %c0_i32_0 = arith.constant 0 : i32
    %c0_i32_1 = arith.constant 0 : i32
    return %arg0, %c0_i32, %c0_i32_0 : i32, i32, i32
  }
  func.func @transform_1(%arg0: i32) -> (i32, i32) {
    %c0_i32 = arith.constant 0 : i32
    %c0_i32_0 = arith.constant 0 : i32
    %c0_i32_1 = arith.constant 0 : i32
    return %c0_i32, %c0_i32_0 : i32, i32
  }
  func.func @transform_2(%arg0: i32) -> (i32, i32) {
    %c0_i32 = arith.constant 0 : i32
    %c0_i32_0 = arith.constant 0 : i32
    %c0_i32_1 = arith.constant 0 : i32
    return %c0_i32, %c0_i32_0 : i32, i32
  }
  func.func @transform_3(%arg0: i32) -> (i32, i32) {
    %c0_i32 = arith.constant 0 : i32
    %c0_i32_0 = arith.constant 0 : i32
    return %arg0, %c0_i32 : i32, i32
  }
}

</mosaic_0001>

<bundles_post_ra>
// kernel: tpu_custom_call.1
= control target key start
LH: loop header
LB: loop body
LE: loop exit
PB: predicated region body
PF: predicated region fallthrough
CT: control target
= control target key end

     0   :  { %vm31_vm0 = vcmask 130048   ;;  %s688_s0 = inlined_call_operand.vmem [shape: f32[2,64,16], index: 0, kind: input, shape index: {}]   ;;  %s689_s1 = inlined_call_operand.vmem [shape: f32[64,4], index: 1, kind: input, shape index: {}]   ;;  %s690_s2 = inlined_call_operand.vmem [shape: f32[4,64], index: 2, kind: input, shape index: {}]   ;;  %s691_s3 = inlined_call_operand.hbm [shape: f32[2,64], index: 3, kind: output, shape index: {}]  }
   0x1   :  { %v23_v0 = vld [vmem:[%s688_s0 + $0x40] sm:$0xff]  ;;  %v17_v1 = vld [vmem:[%s688_s0 + $0x10] sm:$0xff]  ;;  %v24_v6 = vld [vmem:[%s688_s0 + $0x48] sm:$0xff] }
   0x2   :  { %v15_v2 = vld [vmem:[%s688_s0] sm:$0xff]  ;;  %v56_v3 = vsel %vm31_vm0, %v23_v0, 0.0  ;;  %v38_v4 = vsel %vm31_vm0, %v17_v1, 0.0  ;;  %v25_v7 = vld [vmem:[%s688_s0 + $0x50] sm:$0xff]  ;;  %v16_v8 = vld [vmem:[%s688_s0 + $0x8] sm:$0xff] }
   0x3   :  { %v32_v5 = vsel %vm31_vm0, %v15_v2, 0.0  ;;  %57 = vadd.xlane.f32.xlu1 %v56_v3  ;;  %39 = vadd.xlane.f32.xlu2 %v38_v4 }
   0x4   :  { %33 = vadd.xlane.f32.xlu0 %v32_v5 }
   0x5   :  { %8 = vsyncpa [#allocation3], 0  ;;  %v59_v9 = vsel %vm31_vm0, %v24_v6, 0.0  ;;  %v62_v10 = vsel %vm31_vm0, %v25_v7, 0.0  ;;  %v35_v11 = vsel %vm31_vm0, %v16_v8, 0.0  ;;  %v26_v12 = vld [vmem:[%s688_s0 + $0x58] sm:$0xff] }
   0x6   :  { %v18_v13 = vld [vmem:[%s688_s0 + $0x18] sm:$0xff]  ;;  %v65_v14 = vsel %vm31_vm0, %v26_v12, 0.0  ;;  %v96_v15 = vsel %vm31_vm0, %v15_v2, -inf  ;;  %v120_v17 = vsel %vm31_vm0, %v23_v0, -inf  ;;  %v123_v18 = vsel %vm31_vm0, %v24_v6, -inf  ;;  %v27_v20 = vld [vmem:[%s688_s0 + $0x60] sm:$0xff] }
   0x7   :  { %v41_v16 = vsel %vm31_vm0, %v18_v13, 0.0  ;;  %v99_v19 = vsel %vm31_vm0, %v16_v8, -inf  ;;  %v19_v21 = vld [vmem:[%s688_s0 + $0x20] sm:$0xff]  ;;  %v68_v22 = vsel %vm31_vm0, %v27_v20, 0.0  ;;  %v102_v23 = vsel %vm31_vm0, %v17_v1, -inf  ;;  %v20_v25 = vld [vmem:[%s688_s0 + $0x28] sm:$0xff] }
   0x8   :  { %v44_v24 = vsel %vm31_vm0, %v19_v21, 0.0  ;;  %v28_v26 = vld [vmem:[%s688_s0 + $0x68] sm:$0xff]  ;;  %v47_v27 = vsel %vm31_vm0, %v20_v25, 0.0  ;;  %v126_v29 = vsel %vm31_vm0, %v25_v7, -inf  ;;  %v21_v30 = vld [vmem:[%s688_s0 + $0x30] sm:$0xff]  ;;  %v129_v31 = vsel %vm31_vm0, %v26_v12, -inf }
   0x9   :  { %v71_v28 = vsel %vm31_vm0, %v28_v26, 0.0  ;;  %v50_v32 = vsel %vm31_vm0, %v21_v30, 0.0  ;;  %v105_v33 = vsel %vm31_vm0, %v18_v13, -inf  ;;  %v29_v34 = vld [vmem:[%s688_s0 + $0x70] sm:$0xff]  ;;  %v108_v35 = vsel %vm31_vm0, %v19_v21, -inf  ;;  %v30_v38 = vld [vmem:[%s688_s0 + $0x78] sm:$0xff] }
   0xa   :  { %v132_v36 = vsel %vm31_vm0, %v27_v20, -inf  ;;  %v74_v37 = vsel %vm31_vm0, %v29_v34, 0.0  ;;  %v22_v39 = vld [vmem:[%s688_s0 + $0x38] sm:$0xff]  ;;  %v77_v40 = vsel %vm31_vm0, %v30_v38, 0.0  ;;  %v111_v41 = vsel %vm31_vm0, %v20_v25, -inf  ;;  %v150_v61 = vld [vmem:[%s689_s1 + $0x30] sm:$0xff] }
   0xb   :  { %60 = vadd.xlane.f32.xlu1 %v59_v9  ;;  %63 = vadd.xlane.f32.xlu2 %v62_v10  ;;  %v53_v42 = vsel %vm31_vm0, %v22_v39, 0.0  ;;  %v114_v43 = vsel %vm31_vm0, %v21_v30, -inf  ;;  %v138_v44 = vsel %vm31_vm0, %v29_v34, -inf  ;;  %v135_v45 = vsel %vm31_vm0, %v28_v26, -inf  ;;  %v151_v57 = vld [vmem:[%s689_s1 + $0x38] sm:$0xff]  ;;  %v149_v62 = vld [vmem:[%s689_s1 + $0x28] sm:$0xff] }
   0xc   :  { %36 = vadd.xlane.f32.xlu0 %v35_v11  ;;  %v141_v46 = vsel %vm31_vm0, %v30_v38, -inf  ;;  %v117_v47 = vsel %vm31_vm0, %v22_v39, -inf  ;;  %228 = vmatpush.msra.mxu0 %v151_v57  ;;  %v148_v63 = vld [vmem:[%s689_s1 + $0x20] sm:$0xff]  ;;  %v147_v0 = vld [vmem:[%s689_s1 + $0x18] sm:$0xff]  ;;  %v146_v4 = vld [vmem:[%s689_s1 + $0x10] sm:$0xff]  ;;  %v169_v10 = vlaneseq  ;;  %vm174_vm1 = vcmask 130112  }
   0xd   :  { %298 = vmatpush.msra.mxu1 %v151_v57  ;;  %v145_v5 = vld [vmem:[%s689_s1 + $0x8] sm:$0xff]  ;;  %v144_v6 = vld [vmem:[%s689_s1] sm:$0xff]  ;;  %vm178_vm2 = vcmask 195712   ;;  %vm182_vm3 = vcmask 261312   ;;  %vm186_vm4 = vcmask 326912   ;;  %vm190_vm5 = vcmask 392512  }
   0xe   :  { %229 = vmatpush.msra.mxu0 %v150_v61  ;;  %vm194_vm6 = vcmask 458112   ;;  %vm198_vm7 = vcmask 523712   ;;  %vm215_vm8 = vcmask 1041409   ;;  %vm217_vm9 = vcmask 523264   ;;  %s390_s9 = sshll.u32 %s691_s3, 4  ;;  %s391_s9 = int_to_ptr.hbm [resolvable:$true] %s390_s9 }
   0xf   :  { %299 = vmatpush.msra.mxu1 %v150_v61  ;;  %vm315_vm10 = vcmask 1043456   ;;  %vm311_vm11 = vcmask 31744   ;;  %vm381_vm15 = vcmask 517120  }
  0x10   :  { %230 = vmatpush.msra.mxu0 %v149_v62 }
  0x11   :  { %300 = vmatpush.msra.mxu1 %v149_v62 }
  0x12   :  { %231 = vmatpush.msra.mxu0 %v148_v63 }
  0x13   :  { %66 = vadd.xlane.f32.xlu1 %v65_v14  ;;  %97 = vmax.xlane.f32.xlu2 %v96_v15  ;;  %v580_v14 = vand.u32 127, %v169_v10 }
  0x14   :  { %42 = vadd.xlane.f32.xlu0 %v41_v16  ;;  %301 = vmatpush.msra.mxu1 %v148_v63 }
  0x15   :  { %232 = vmatpush.msra.mxu0 %v147_v0  ;;  %v583_v15 = vadd.s32 4294967288, %v580_v14 }
  0x16   :  { %302 = vmatpush.msra.mxu1 %v147_v0 }
  0x17   :  { %233 = vmatpush.msra.mxu0 %v146_v4 }
  0x18   :  { %303 = vmatpush.msra.mxu1 %v146_v4 }
  0x19   :  { %234 = vmatpush.msra.mxu0 %v145_v5 }
  0x1a   :  { %304 = vmatpush.msra.mxu1 %v145_v5 }
  0x1b   :  { %121 = vmax.xlane.f32.xlu1 %v120_v17  ;;  %124 = vmax.xlane.f32.xlu2 %v123_v18 }
  0x1c   :  { %100 = vmax.xlane.f32.xlu0 %v99_v19  ;;  %235 = vmatpush.msra.mxu0 %v144_v6  ;;  %v586_v19 = vadd.s32 4294967280, %v580_v14 }
  0x1d   :  { %305 = vmatpush.msra.mxu1 %v144_v6 }
  0x23   :  { %69 = vadd.xlane.f32.xlu1 %v68_v22  ;;  %103 = vmax.xlane.f32.xlu2 %v102_v23  ;;  %v590_v23 = vadd.s32 4294967272, %v580_v14 }
  0x24   :  { %45 = vadd.xlane.f32.xlu0 %v44_v24 }
  0x2b   :  { %48 = vadd.xlane.f32.xlu1 %v47_v27  ;;  %72 = vadd.xlane.f32.xlu2 %v71_v28  ;;  %v598_v28 = vadd.s32 4294967264, %v580_v14 }
  0x2c   :  { %127 = vmax.xlane.f32.xlu0 %v126_v29 }
  0x33   :  { %130 = vmax.xlane.f32.xlu1 %v129_v31  ;;  %51 = vadd.xlane.f32.xlu2 %v50_v32 }
  0x34   :  { %106 = vmax.xlane.f32.xlu0 %v105_v33 }
  0x3b   :  { %109 = vmax.xlane.f32.xlu1 %v108_v35  ;;  %133 = vmax.xlane.f32.xlu2 %v132_v36  ;;  %v604_v36 = vadd.s32 4294967256, %v580_v14 }
  0x3c   :  { %75 = vadd.xlane.f32.xlu0 %v74_v37 }
  0x43   :  { %78 = vadd.xlane.f32.xlu1 %v77_v40  ;;  %112 = vmax.xlane.f32.xlu2 %v111_v41 }
  0x44   :  { %54 = vadd.xlane.f32.xlu0 %v53_v42 }
  0x4b   :  { %115 = vmax.xlane.f32.xlu1 %v114_v43  ;;  %139 = vmax.xlane.f32.xlu2 %v138_v44  ;;  %v611_v44 = vadd.s32 4294967248, %v580_v14 }
  0x4c   :  { %136 = vmax.xlane.f32.xlu0 %v135_v45 }
  0x53   :  { %142 = vmax.xlane.f32.xlu1 %v141_v46 }
  0x54   :  { %118 = vmax.xlane.f32.xlu0 %v117_v47 }
  0x76   :  { %v58_v48 = vpop.xlane.xlu1 %57  ;;  %v538_v49 = vpop.xlane.xlu2 %39 }
  0x77   :  { %v34_v50 = vpop.xlane.xlu0 %33  ;;  %v88_v18 = vmul.f32 0.0625, %v58_v48  ;;  %v82_v31 = vmul.f32 0.0625, %v538_v49 }
  0x78   :  { %v80_v20 = vmul.f32 0.0625, %v34_v50 }
  0x79   :  { %v200_v30 = vperm.slane %v88_v18, %v580_v14  ;;  %v177_v46 = vperm.slane %v82_v31, %v586_v19 }
  0x7a   :  { %v171_v34 = vperm.slane %v80_v20, %v580_v14 }
  0x7e   :  { %v61_v51 = vpop.xlane.xlu1 %60  ;;  %v64_v52 = vpop.xlane.xlu2 %63 }
  0x7f   :  { %v37_v53 = vpop.xlane.xlu0 %36  ;;  %v89_v16 = vmul.f32 0.0625, %v61_v51  ;;  %v90_v22 = vmul.f32 0.0625, %v64_v52  ;;  %v619_v51 = vadd.s32 4294967240, %v580_v14 }
  0x80   :  { %v81_v17 = vmul.f32 0.0625, %v37_v53 }
  0x81   :  { %v201_v21 = vperm.slane %v89_v16, %v583_v15  ;;  %v203_v39 = vperm.slane %v90_v22, %v586_v19 }
  0x82   :  { %v173_v26 = vperm.slane %v81_v17, %v583_v15 }
  0x83   :  { %v202_v38 = vsel %vm174_vm1, %v201_v21, %v200_v30 }
  0x84   :  { %v175_v42 = vsel %vm174_vm1, %v173_v26, %v171_v34  ;;  %v204_v52 = vsel %vm178_vm2, %v203_v39, %v202_v38 }
  0x85   :  { %v179_v53 = vsel %vm178_vm2, %v177_v46, %v175_v42 }
  0x86   :  { %v67_v54 = vpop.xlane.xlu1 %66  ;;  %v540_v55 = vpop.xlane.xlu2 %97 }
  0x87   :  { %v43_v56 = vpop.xlane.xlu0 %42  ;;  %v91_v27 = vmul.f32 0.0625, %v67_v54 }
  0x88   :  { %v83_v32 = vmul.f32 0.0625, %v43_v56 }
  0x89   :  { %v205_v43 = vperm.slane %v91_v27, %v590_v23 }
  0x8a   :  { %v181_v47 = vperm.slane %v83_v32, %v590_v23  ;;  %v257_v32 = vperm.slane %v540_v55, %v580_v14 }
  0x8b   :  { %v206_v61 = vsel %vm182_vm3, %v205_v43, %v204_v52 }
  0x8e   :  { %v545_v58 = vpop.xlane.xlu1 %121  ;;  %v547_v59 = vpop.xlane.xlu2 %124 }
  0x8f   :  { %v549_v60 = vpop.xlane.xlu0 %100  ;;  %v272_v21 = vperm.slane %v545_v58, %v580_v14  ;;  %v273_v22 = vperm.slane %v547_v59, %v583_v15 }
  0x90   :  { %v258_v58 = vperm.slane %v549_v60, %v583_v15 }
  0x92   :  { %v259_v14 = vsel %vm174_vm1, %v258_v58, %v257_v32 }
  0x96   :  { %v70_v1 = vpop.xlane.xlu1 %69  ;;  %v563_v2 = vpop.xlane.xlu2 %103 }
  0x97   :  { %v46_v3 = vpop.xlane.xlu0 %45  ;;  %v92_v33 = vmul.f32 0.0625, %v70_v1 }
  0x98   :  { %v84_v35 = vmul.f32 0.0625, %v46_v3  ;;  %v183_v3 = vsel %vm182_vm3, %v181_v47, %v179_v53  ;;  %v152_v47 = vld [vmem:[%s690_s2] sm:$0xf]  ;;  %s437_s2 = smov [#allocation2]  }
  0x99   :  { %v207_v48 = vperm.slane %v92_v33, %v598_v28  ;;  %v274_v33 = vsel %vm174_vm1, %v273_v22, %v272_v21  ;;  %403 = vmatpush.msk.msra.mxu3 %vm315_vm10, %v152_v47  ;;  %401 = vmatpush.msk.msra.mxu2 %vm315_vm10, %v152_v47  ;;  %s388_s6 = sshll.u32 %s437_s2, 4  ;;  %s389_s6 = int_to_ptr.vmem [resolvable:$true] %s388_s6 }
  0x9a   :  { %v185_v49 = vperm.slane %v84_v35, %v598_v28 }
  0x9b   :  { %v208_v4 = vsel %vm186_vm4, %v207_v48, %v206_v61 }
  0x9c   :  { %v187_v6 = vsel %vm186_vm4, %v185_v49, %v183_v3 }
  0x9e   :  { %v49_v7 = vpop.xlane.xlu1 %48  ;;  %v73_v8 = vpop.xlane.xlu2 %72 }
  0x9f   :  { %v574_v9 = vpop.xlane.xlu0 %127  ;;  %v93_v37 = vmul.f32 0.0625, %v73_v8  ;;  %v85_v40 = vmul.f32 0.0625, %v49_v7 }
  0xa0   :  { %v275_v27 = vperm.slane %v574_v9, %v586_v19  ;;  %v260_v9 = vperm.slane %v563_v2, %v586_v19 }
  0xa1   :  { %v209_v50 = vperm.slane %v93_v37, %v604_v36  ;;  %v189_v54 = vperm.slane %v85_v40, %v604_v36 }
  0xa2   :  { %v261_v19 = vsel %vm178_vm2, %v260_v9, %v259_v14 }
  0xa3   :  { %v210_v7 = vsel %vm190_vm5, %v209_v50, %v208_v4  ;;  %v191_v10 = vsel %vm190_vm5, %v189_v54, %v187_v6 }
  0xa6   :  { %v576_v11 = vpop.xlane.xlu1 %130  ;;  %v52_v12 = vpop.xlane.xlu2 %51 }
  0xa7   :  { %v578_v13 = vpop.xlane.xlu0 %106  ;;  %v86_v45 = vmul.f32 0.0625, %v52_v12  ;;  %v277_v30 = vperm.slane %v576_v11, %v590_v23  ;;  %v276_v11 = vsel %vm178_vm2, %v275_v27, %v274_v33 }
  0xa8   :  { %v262_v37 = vperm.slane %v578_v13, %v590_v23 }
  0xa9   :  { %v193_v62 = vperm.slane %v86_v45, %v611_v44  ;;  %v278_v55 = vsel %vm182_vm3, %v277_v30, %v276_v11 }
  0xaa   :  { %v263_v13 = vsel %vm182_vm3, %v262_v37, %v261_v19 }
  0xab   :  { %v195_v17 = vsel %vm194_vm6, %v193_v62, %v191_v10 }
  0xae   :  { %v592_v24 = vpop.xlane.xlu1 %109  ;;  %v594_v25 = vpop.xlane.xlu2 %133 }
  0xaf   :  { %v76_v29 = vpop.xlane.xlu0 %75  ;;  %v279_v59 = vperm.slane %v594_v25, %v598_v28  ;;  %v264_v60 = vperm.slane %v592_v24, %v598_v28 }
  0xb0   :  { %v94_v41 = vmul.f32 0.0625, %v76_v29 }
  0xb1   :  { %v280_v15 = vsel %vm186_vm4, %v279_v59, %v278_v55  ;;  %v265_v40 = vsel %vm186_vm4, %v264_v60, %v263_v13 }
  0xb2   :  { %v211_v56 = vperm.slane %v94_v41, %v611_v44 }
  0xb4   :  { %v212_v16 = vsel %vm194_vm6, %v211_v56, %v210_v7 }
  0xb6   :  { %v79_v57 = vpop.xlane.xlu1 %78  ;;  %v113_v0 = vpop.xlane.xlu2 %112 }
  0xb7   :  { %v95_v63 = vmul.f32 0.0625, %v79_v57  ;;  %v55_v1 = vpop.xlane.xlu0 %54  ;;  %v266_v25 = vperm.slane %v113_v0, %v604_v36 }
  0xb8   :  { %v87_v5 = vmul.f32 0.0625, %v55_v1 }
  0xb9   :  { %v213_v8 = vperm.slane %v95_v63, %v619_v51  ;;  %v267_v41 = vsel %vm190_vm5, %v266_v25, %v265_v40 }
  0xba   :  { %v197_v12 = vperm.slane %v87_v5, %v619_v51 }
  0xbb   :  { %v214_v18 = vsel %vm198_vm7, %v213_v8, %v212_v16 }
  0xbc   :  { %v199_v20 = vsel %vm198_vm7, %v197_v12, %v195_v17 }
  0xbd   :  { %v216_v26 = vsel %vm215_vm8, %v214_v18, %v199_v20 }
  0xbe   :  { %399 = vmatmul.msk.f32.vlgmr.msra.gmra.mxu0 %vm217_vm9, %v216_v26  ;;  %v116_v29 = vpop.xlane.xlu1 %115  ;;  %v140_v35 = vpop.xlane.xlu2 %139 }
  0xbf   :  { %v137_v31 = vpop.xlane.xlu0 %136  ;;  %v283_v2 = vperm.slane %v140_v35, %v611_v44  ;;  %v268_v38 = vperm.slane %v116_v29, %v611_v44 }
  0xc0   :  { %v281_v34 = vperm.slane %v137_v31, %v604_v36 }
  0xc1   :  { %v269_v43 = vsel %vm194_vm6, %v268_v38, %v267_v41 }
  0xc2   :  { %v282_v39 = vsel %vm190_vm5, %v281_v34, %v280_v15 }
  0xc3   :  { %v284_v36 = vsel %vm194_vm6, %v283_v2, %v282_v39 }
  0xc6   :  { %v143_v23 = vpop.xlane.xlu1 %142 }
  0xc7   :  { %v285_v24 = vperm.slane %v143_v23, %v619_v51  ;;  %v119_v28 = vpop.xlane.xlu0 %118 }
  0xc8   :  { %v270_v42 = vperm.slane %v119_v28, %v619_v51 }
  0xc9   :  { %v286_v44 = vsel %vm198_vm7, %v285_v24, %v284_v36 }
  0xca   :  { %v271_v45 = vsel %vm198_vm7, %v270_v42, %v269_v43 }
  0xcb   :  { %v287_v46 = vsel %vm215_vm8, %v286_v44, %v271_v45 }
  0xcc   :  { %400 = vmatmul.msk.f32.vlgmr.msra.gmra.mxu1 %vm217_vm9, %v287_v46 }
 0x13b   :  { %v237_v48 = vpop.f32.mrf.mxu0 }
 0x13c   :  { %v240_v49 = vmax.f32 %v237_v48, 0.0 }
 0x13e   :  { %404 = vmatmul.msk.f32.vlgmr.msra.gmra.mxu3 %vm311_vm11, %v240_v49 }
 0x149   :  { %v307_v50 = vpop.f32.mrf.mxu1 }
 0x14a   :  { %v310_v51 = vmax.f32 %v307_v50, 0.0 }
 0x14c   :  { %402 = vmatmul.msk.f32.vlgmr.msra.gmra.mxu2 %vm311_vm11, %v310_v51 }
 0x1c1   :  { %v359_v52 = vpop.f32.mrf.mxu3 }
 0x1cf   :  { %v336_v53 = vpop.f32.mrf.mxu2 }
 0x1d0   :  { %v360_v54 = vadd.f32 %v359_v52, %v336_v53 }
 0x1d2   :  { %v405_v56 = vmul.f32 -1.442695, %v360_v54 }
 0x1d4   :  { %407 = vpow2.f32 %v405_v56 }
 0x1da   :  { %v408_v57 = vpop.eup %407 }
 0x1db   :  { %v365_v61 = vadd.f32 1.0, %v408_v57 }
 0x1dd   :  { %409 = vrcp.f32 %v365_v61  ;;  %v377_v1 = vand.u32 2147483648, %v365_v61  ;;  %v375_v4 = vand.u32 2147483647, %v365_v61  ;;  %vm371_vm13 = vweird.f32 %v365_v61 }
 0x1df   :  { %v378_v6 = vor.u32 1.1754944e-38, %v377_v1  ;;  %vm376_vm0 = vcmp.eq.f32.partialorder %v375_v4, 8.507059e+37 }
 0x1e3   :  { %v410_v62 = vpop.eup %409 }
 0x1e4   :  { %v367_v63 = vmul.f32 %v410_v62, %v365_v61  ;;  %vm372_vm12 = vweird.f32 %v410_v62 }
 0x1e5   :  { %vm373_vm14 = vmor %vm371_vm13, %vm372_vm12 }
 0x1e6   :  { %v368_v0 = vsub.f32 1.0, %v367_v63 }
 0x1e8   :  { %v369_v3 = vmul.f32 %v410_v62, %v368_v0 }
 0x1ea   :  { %v370_v5 = vadd.f32 %v410_v62, %v369_v3 }
 0x1ec   :  { %v374_v7 = vsel %vm373_vm14, %v410_v62, %v370_v5 }
 0x1ed   :  { %v379_v8 = vsel %vm376_vm0, %v378_v6, %v374_v7 }
 0x1ee   :  { %382 = vst.msk [vmem:[#allocation2] sm:$0x3] %vm381_vm15, %v379_v8 }
 0x1ef   :  { %393 = dma.vmem_to_hbm [thread:$0]  %s389_s6, 32, %s391_s9, [#allocation3]  }
 0x1f0   :  { %435 = dma.done.wait [#allocation3], 32  }
 0x1f1   :  { %436 = vsyncadd [#allocation3], 4294967264 }
 0x1f2   :  { %398 = vsyncpa [#allocation3], 1 }

</bundles_post_ra>
